<compile_context>
chip_gen: v7x
topology: tpu7x:2x2x1
jax: 0.10.0
libtpu: 0.0.40
codegen_flags: <defaults>
</compile_context>

<pallas_src>
import jax
import jax.numpy as jnp
from jax.experimental import pallas as pl
from jax.experimental.pallas import tpu as pltpu


# ----------------------------------------------------------------------------
# Kernels
# ----------------------------------------------------------------------------
def _linear_kernel_single_k(x_ref, w_ref, b_ref, y_ref):
    """One (tm, tn) output tile of y = x @ W + b, full K in one block."""
    y_ref[...] = (
        jnp.dot(x_ref[...], w_ref[...], preferred_element_type=jnp.float32)
        + b_ref[...]
    ).astype(y_ref.dtype)


def _linear_kernel_multi_k(x_ref, w_ref, b_ref, y_ref, acc_ref):
    """One (tm, tn) output tile of y = x @ W + b, accumulated over K tiles."""
    k = pl.program_id(2)

    @pl.when(k == 0)
    def _():
        acc_ref[...] = jnp.zeros_like(acc_ref)

    acc_ref[...] += jnp.dot(
        x_ref[...], w_ref[...], preferred_element_type=jnp.float32
    )

    @pl.when(k == pl.num_programs(2) - 1)
    def _():
        # Bias is added exactly once, in the epilogue (not per K step).
        y_ref[...] = (acc_ref[...] + b_ref[...]).astype(y_ref.dtype)


# ----------------------------------------------------------------------------
# Tiling helpers
# ----------------------------------------------------------------------------
def _pick_tile(dim: int, target: int) -> int:
    """Largest tile <= target that divides `dim` and is a multiple of 128;
    falls back to the full dim (always legal per the BlockSpec rule)."""
    if dim <= target:
        return dim
    t = target
    while t >= 128:
        if dim % t == 0:
            return t
        t //= 2
    return dim


# ----------------------------------------------------------------------------
# Pallas-backed Linear
# ----------------------------------------------------------------------------
def linear_pallas(x, w_t, b, *, tm=256, tn=256, tk=512):
    """y = x @ w_t + b via a tiled Pallas TPU matmul.

    x:   (M, K)  float32
    w_t: (K, N)  float32   (torch Linear weight (out,in), pre-transposed)
    b:   (1, N)  float32
    """
    m, k_dim = x.shape
    n = w_t.shape[1]

    tm = _pick_tile(m, tm)
    tn = _pick_tile(n, tn)
    tk = _pick_tile(k_dim, tk)

    flops = 2 * m * k_dim * n
    bytes_accessed = 4 * (m * k_dim + k_dim * n + n + m * n)
    cost = pl.CostEstimate(
        flops=flops, transcendentals=0, bytes_accessed=bytes_accessed
    )
    cparams = dict(vmem_limit_bytes=32 * 1024 * 1024)  # fits v7x scoped VMEM

    if tk == k_dim:
        # Fast path: whole reduction in one block, no scratch accumulator.
        grid = (m // tm, n // tn)
        return pl.pallas_call(
            _linear_kernel_single_k,
            out_shape=jax.ShapeDtypeStruct((m, n), x.dtype),
            grid_spec=pl.GridSpec(
                grid=grid,
                in_specs=[
                    pl.BlockSpec((tm, k_dim), lambda i, j: (i, 0)),
                    pl.BlockSpec((k_dim, tn), lambda i, j: (0, j)),
                    pl.BlockSpec((1, tn), lambda i, j: (0, j)),
                ],
                out_specs=pl.BlockSpec((tm, tn), lambda i, j: (i, j)),
            ),
            compiler_params=pltpu.CompilerParams(
                dimension_semantics=("parallel", "parallel"), **cparams
            ),
            cost_estimate=cost,
        )(x, w_t, b)

    # General path: K is tiled; output-resident f32 accumulator.
    grid = (m // tm, n // tn, k_dim // tk)
    return pl.pallas_call(
        _linear_kernel_multi_k,
        out_shape=jax.ShapeDtypeStruct((m, n), x.dtype),
        grid_spec=pl.GridSpec(
            grid=grid,
            in_specs=[
                pl.BlockSpec((tm, tk), lambda i, j, k: (i, k)),
                pl.BlockSpec((tk, tn), lambda i, j, k: (k, j)),
                pl.BlockSpec((1, tn), lambda i, j, k: (0, j)),
            ],
            out_specs=pl.BlockSpec((tm, tn), lambda i, j, k: (i, j)),
            scratch_shapes=[pltpu.VMEM((tm, tn), jnp.float32)],
        ),
        compiler_params=pltpu.CompilerParams(
            dimension_semantics=("parallel", "parallel", "arbitrary"), **cparams
        ),
        cost_estimate=cost,
    )(x, w_t, b)


# ----------------------------------------------------------------------------
# Wrapped module + TupleWrapper semantics
# ----------------------------------------------------------------------------
def inner_module_forward(x, w_t, b):
    """Wrapped module: returns the tuple (x @ W + b, x).

    Only the matmul is computed by the kernel; the second tuple element is
    the original input array (no kernel writeback of a dead output).
    """
    lead = x.shape[:-1]
    k_dim = x.shape[-1]
    x2d = x.reshape((-1, k_dim))
    y2d = linear_pallas(x2d, w_t, b)
    y = y2d.reshape(lead + (w_t.shape[1],))
    return y, x


def tuple_wrapper_forward(x, w_t, b):
    """TupleWrapper semantics: run the wrapped module, return element [0]."""
    return inner_module_forward(x, w_t, b)[0]


if __name__ == "__main__":
    key = jax.random.PRNGKey(0)
    k_x, k_w, k_b = jax.random.split(key, 3)

    batch, seq, hidden = 2, 8, 32
    x = jax.random.normal(k_x, (batch, seq, hidden), dtype=jnp.float32)

    # Deterministic parameter init for the inner Linear(hidden -> hidden).
    w = jax.random.normal(k_w, (hidden, hidden), dtype=jnp.float32) * 0.05
    b = jax.random.normal(k_b, (1, hidden), dtype=jnp.float32) * 0.05
    w_t = w.T  # pre-transpose torch-style (out, in) weight to (in, out)

    y = tuple_wrapper_forward(x, w_t, b)
    jax.block_until_ready(y)

    # Reference check (plain JAX) for the same forward.
    y_ref = x.reshape(-1, hidden) @ w_t + b
    assert y.shape == (batch, seq, hidden)
    assert jnp.allclose(y.reshape(-1, hidden), y_ref, atol=1e-5, rtol=1e-5)

    print("KERNEL_OK")
</pallas_src>

<mosaic_0001>
module attributes {stable_mosaic.version = 11 : i64} {
  func.func @_linear_kernel_single_k(%arg0: i32, %arg1: i32, %arg2: memref<16x32xf32, #tpu.memory_space<vmem>>, %arg3: memref<32x32xf32, #tpu.memory_space<vmem>>, %arg4: memref<1x32xf32, #tpu.memory_space<vmem>>, %arg5: memref<16x32xf32, #tpu.memory_space<vmem>>) attributes {dimension_semantics = [#tpu.dimension_semantics<parallel>, #tpu.dimension_semantics<parallel>], iteration_bounds = array<i64: 1, 1>, scalar_prefetch = 0 : i64, scratch_operands = 0 : i64, tpu.core_type = #tpu.core_type<tc>, window_params = [{transform_indices = @transform_0, window_bounds = array<i64: 16, 32>}, {transform_indices = @transform_1, window_bounds = array<i64: 32, 32>}, {transform_indices = @transform_2, window_bounds = array<i64: 1, 32>}, {transform_indices = @transform_3, window_bounds = array<i64: 16, 32>}]} {
    %c0 = arith.constant 0 : index
    %c0_0 = arith.constant 0 : index
    %0 = vector.load %arg2[%c0, %c0_0] : memref<16x32xf32, #tpu.memory_space<vmem>>, vector<16x32xf32>
    %c0_1 = arith.constant 0 : index
    %c0_2 = arith.constant 0 : index
    %1 = vector.load %arg3[%c0_1, %c0_2] : memref<32x32xf32, #tpu.memory_space<vmem>>, vector<32x32xf32>
    %cst = arith.constant dense<0.000000e+00> : vector<16x32xf32>
    %2 = tpu.matmul %0, %1, %cst {dimension_numbers = #tpu.dot_dimension_numbers<[1], [0], [0], [1], [0, 0, 1, 1], [], []>} : vector<16x32xf32>, vector<32x32xf32>, vector<16x32xf32> -> vector<16x32xf32>
    %c0_3 = arith.constant 0 : index
    %c0_4 = arith.constant 0 : index
    %3 = vector.load %arg4[%c0_3, %c0_4] : memref<1x32xf32, #tpu.memory_space<vmem>>, vector<1x32xf32>
    %4 = vector.broadcast %3 : vector<1x32xf32> to vector<16x32xf32>
    %5 = arith.addf %2, %4 : vector<16x32xf32>
    %c0_5 = arith.constant 0 : index
    %c0_6 = arith.constant 0 : index
    %6 = vector.load %arg5[%c0_5, %c0_6] : memref<16x32xf32, #tpu.memory_space<vmem>>, vector<16x32xf32>
    tpu.vector_store %arg5[%c0_5, %c0_6], %5 {strides = array<i32>} : memref<16x32xf32, #tpu.memory_space<vmem>>, vector<16x32xf32>,
    return
  }
  func.func @transform_0(%arg0: i32, %arg1: i32) -> (i32, i32) {
    %c0_i32 = arith.constant 0 : i32
    %c0_i32_0 = arith.constant 0 : i32
    return %arg0, %c0_i32 : i32, i32
  }
  func.func @transform_1(%arg0: i32, %arg1: i32) -> (i32, i32) {
    %c0_i32 = arith.constant 0 : i32
    %c0_i32_0 = arith.constant 0 : i32
    return %c0_i32, %arg1 : i32, i32
  }
  func.func @transform_2(%arg0: i32, %arg1: i32) -> (i32, i32) {
    %c0_i32 = arith.constant 0 : i32
    %c0_i32_0 = arith.constant 0 : i32
    return %c0_i32, %arg1 : i32, i32
  }
  func.func @transform_3(%arg0: i32, %arg1: i32) -> (i32, i32) {
    %c0_i32 = arith.constant 0 : i32
    return %arg0, %arg1 : i32, i32
  }
}

</mosaic_0001>

<bundles_post_ra>
// kernel: tpu_custom_call.1
= control target key start
LH: loop header
LB: loop body
LE: loop exit
PB: predicated region body
PF: predicated region fallthrough
CT: control target
= control target key end

     0   :  { %8 = vsyncpa [#allocation3], 0  ;;  %s340_s0 = inlined_call_operand.hbm [shape: f32[16,32], index: 0, kind: input, shape index: {}]   ;;  %s341_s1 = inlined_call_operand.hbm [shape: f32[32,32], index: 1, kind: input, shape index: {}]   ;;  %s342_s2 = inlined_call_operand.vmem [shape: f32[1,32], index: 2, kind: input, shape index: {}]   ;;  %s343_s3 = inlined_call_operand.hbm [shape: f32[16,32], index: 3, kind: output, shape index: {}]  }
   0x1   :  { %9 = vsyncpa [#allocation6], 0 }
   0x2   :  { %10 = vsyncpa [#allocation4], 0  ;;  %s263_s12 = smov [#allocation2]   ;;  %s191_s16 = scalar_lea.hbm %s340_s0, 256 }
   0x3   :  { %s16_s13 = sshll.u32 %s263_s12, 4  ;;  %p192_p0 = scmp.ne.s32.totalorder %s340_s0, %s191_s16  ;;  %s17_s13 = int_to_ptr.vmem [resolvable:$true] %s16_s13 }
   0x4   :  { %p195_p1 = scmp.lt.u32.totalorder %s191_s16, %s340_s0 }
   0x6   :  { %p197_p2 = pnand %p195_p1, %p192_p0 }
   0x8   :  { %200 = shalt.err (!%p197_p2)
}
   0x9   :  { %s201_s21 = scalar_lea.vmem %s17_s13, 256  ;;  %p206_p4 = scmp.lt.s32.totalorder %s17_s13, %s17_s13 }
   0xa   :  { %p202_p3 = scmp.ne.s32.totalorder %s17_s13, %s201_s21  ;;  %p207_p5 = scmp.lt.s32.totalorder %s201_s21, %s201_s21 }
   0xc   :  { %p208_p6 = por %p207_p5, %p206_p4 }
   0xe   :  { %p209_p7 = pnand %p208_p6, %p202_p3 }
  0x10   :  { %212 = shalt.err (!%p209_p7)
}
  0x11   :  { %s264_s22 = smov 128   ;;  %s265_s23 = smov 8  }
  0x12   :  { %22 = dma.hbm_to_vmem [thread:$0]  %s340_s0, 256, %s17_s13, [#allocation3], %s264_s22, %s264_s22, %s265_s23  }
  0x13   :  { %s266_s26 = smov [#allocation5]   ;;  %s213_s30 = scalar_lea.hbm %s341_s1, 512 }
  0x14   :  { %s28_s27 = sshll.u32 %s266_s26, 4  ;;  %p214_p8 = scmp.ne.s32.totalorder %s341_s1, %s213_s30  ;;  %s29_s27 = int_to_ptr.vmem [resolvable:$true] %s28_s27 }
  0x15   :  { %p217_p9 = scmp.lt.u32.totalorder %s213_s30, %s341_s1 }
  0x17   :  { %p219_p10 = pnand %p217_p9, %p214_p8 }
  0x19   :  { %222 = shalt.err (!%p219_p10)
}
  0x1a   :  { %s223_s8 = scalar_lea.vmem %s29_s27, 512  ;;  %p228_p12 = scmp.lt.s32.totalorder %s29_s27, %s29_s27 }
  0x1b   :  { %p224_p11 = scmp.ne.s32.totalorder %s29_s27, %s223_s8  ;;  %p229_p13 = scmp.lt.s32.totalorder %s223_s8, %s223_s8 }
  0x1d   :  { %p230_p0 = por %p229_p13, %p228_p12 }
  0x1f   :  { %p231_p1 = pnand %p230_p0, %p224_p11 }
  0x21   :  { %234 = shalt.err (!%p231_p1)
}
  0x22   :  { %34 = dma.hbm_to_vmem [thread:$0]  %s341_s1, 512, %s29_s27, [#allocation6], %s264_s22, %s264_s22, %s265_s23  }
  0x23   :  { %257 = dma.done.wait [#allocation3], 256  }
  0x24   :  { %258 = vsyncadd [#allocation3], 4294967040 }
  0x25   :  { %259 = dma.done.wait [#allocation6], 512  }
  0x26   :  { %260 = vsyncadd [#allocation6], 4294966784  ;;  %vm56_vm0 = vcmask 261120   ;;  %v45_v0 = vld [vmem:[#allocation5] sm:$0xff]  ;;  %v46_v1 = vld [vmem:[#allocation5 + $0x8] sm:$0xff]  ;;  %s267_s11 = smov [#allocation7]  }
  0x27   :  { %v47_v2 = vld [vmem:[#allocation5 + $0x10] sm:$0xff]  ;;  %v178_v3 = vpack.c.bf16 %v46_v1, %v45_v0  ;;  %v48_v4 = vld [vmem:[#allocation5 + $0x18] sm:$0xff]  ;;  %s145_s12 = sshll.u32 %s267_s11, 4  ;;  %s146_s12 = int_to_ptr.vmem [resolvable:$true] %s145_s12 }
  0x28   :  { %v43_v5 = vld [vmem:[#allocation2] sm:$0xff]  ;;  %v182_v6 = vpack.c.bf16 %v48_v4, %v47_v2  ;;  %v44_v7 = vld [vmem:[#allocation2 + $0x8] sm:$0xff]  ;;  %s235_s13 = scalar_lea.vmem %s146_s12, 256  ;;  %p240_p3 = scmp.lt.s32.totalorder %s146_s12, %s146_s12 }
  0x29   :  { %175 = vmatprep.mubr.msk.f32.mxu0 %vm56_vm0, %v43_v5  ;;  %179 = vmatprep.subr.bf16.mxu0 %v178_v3  ;;  %v158_v8 = vld [vmem:[%s342_s2] ss:$0 sm:$0xff]  ;;  %p236_p2 = scmp.ne.s32.totalorder %s146_s12, %s235_s13  ;;  %p241_p4 = scmp.lt.s32.totalorder %s235_s13, %s235_s13 }
  0x2a   :  { %181 = vmatpush3.bf16.msra.mxu0 %v178_v3 }
  0x2b   :  { %183 = vmatprep.subr.bf16.mxu0 %v182_v6  ;;  %p242_p5 = por %p241_p4, %p240_p3 }
  0x2d   :  { %p243_p6 = pnand %p242_p5, %p236_p2 }
  0x2e   :  { %185 = vmatpush3.bf16.msra.mxu0 %v182_v6 }
  0x31   :  { %176 = vmatmul.mubr.msk.f32.vlgmr.msra.gmra.mrb[0].mxu0 %vm56_vm0, %v44_v7 }
 0x104   :  { %v177_v9 = vpop.f32.mrb[0].mxu0 }
 0x105   :  { %v135_v10 = vadd.f32 %v177_v9, %v158_v8  ;;  %v129_v11 = vpop.f32.mrb[1].mxu0 }
 0x106   :  { %v130_v12 = vadd.f32 %v158_v8, %v129_v11 }
 0x107   :  { %139 = vst.msk [vmem:[#allocation7 + $0x8] sm:$0xff] %vm56_vm0, %v135_v10 }
 0x108   :  { %138 = vst.msk [vmem:[#allocation7] sm:$0xff] %vm56_vm0, %v130_v12 }
 0x109   :  { %246 = shalt.err (!%p243_p6)
}
 0x10a   :  { %s247_s15 = scalar_lea.hbm %s343_s3, 256 }
 0x10b   :  { %p248_p7 = scmp.ne.s32.totalorder %s343_s3, %s247_s15  ;;  %p251_p8 = scmp.lt.u32.totalorder %s247_s15, %s343_s3 }
 0x10d   :  { %p253_p9 = pnand %p251_p8, %p248_p7 }
 0x10f   :  { %256 = shalt.err (!%p253_p9)
}
 0x110   :  { %151 = dma.vmem_to_hbm [thread:$0]  %s146_s12, 256, %s343_s3, [#allocation4], %s264_s22, %s264_s22, %s265_s23  }
 0x111   :  { %261 = dma.done.wait [#allocation4], 256  }
 0x112   :  { %262 = vsyncadd [#allocation4], 4294967040 }
 0x113   :  { %155 = vsyncpa [#allocation3], 1 }
 0x114   :  { %156 = vsyncpa [#allocation6], 1 }
 0x115   :  { %157 = vsyncpa [#allocation4], 1 }

</bundles_post_ra>
